<compile_context>
chip_gen: v5e
topology: v5e:2x2
jax: 0.10.0
libtpu: 0.0.40
codegen_flags: <defaults>
</compile_context>

<pallas_src>
import numpy as np
import jax
import jax.numpy as jnp
from jax.experimental import pallas as pl
from jax.experimental.pallas import tpu as pltpu

N_QUBITS = 8
DIM = 2 ** N_QUBITS              # 256 amplitudes
U_PARAMS = 15                    # U_SU4
TOTAL_PARAMS = U_PARAMS * 3 + 6  # 51
MAX_TILE_B = 1024                # upper bound on batch tile (sweepable 512-2048)

# ----------------------------------------------------------------------------
# Host-side construction of the circuit unitary (numpy, complex128).
# Pure parameter setup; done once per weight set, NOT per forward call.
# ----------------------------------------------------------------------------
I2 = np.eye(2, dtype=np.complex128)
PAULI_X = np.array([[0, 1], [1, 0]], dtype=np.complex128)

def rx(t):
    c, s = np.cos(t / 2), np.sin(t / 2)
    return np.array([[c, -1j * s], [-1j * s, c]], dtype=np.complex128)

def ry(t):
    c, s = np.cos(t / 2), np.sin(t / 2)
    return np.array([[c, -s], [s, c]], dtype=np.complex128)

def rz(t):
    return np.array([[np.exp(-1j * t / 2), 0], [0, np.exp(1j * t / 2)]],
                    dtype=np.complex128)

def u3(t, p, l):
    c, s = np.cos(t / 2), np.sin(t / 2)
    return np.array([[c, -np.exp(1j * l) * s],
                     [np.exp(1j * p) * s, np.exp(1j * (p + l)) * c]],
                    dtype=np.complex128)

# 4x4 matrices in the |w0 w1> basis (w0 = first listed wire = more significant).
CNOT_01 = np.array([[1, 0, 0, 0], [0, 1, 0, 0],
                    [0, 0, 0, 1], [0, 0, 1, 0]], dtype=np.complex128)  # ctrl w0
CNOT_10 = np.array([[1, 0, 0, 0], [0, 0, 0, 1],
                    [0, 0, 1, 0], [0, 1, 0, 0]], dtype=np.complex128)  # ctrl w1

def on0(g): return np.kron(g, I2)
def on1(g): return np.kron(I2, g)

def crz_01(t):
    m = np.eye(4, dtype=np.complex128)
    m[2, 2] = np.exp(-1j * t / 2)
    m[3, 3] = np.exp(1j * t / 2)
    return m

def crx_01(t):
    m = np.eye(4, dtype=np.complex128)
    m[2:, 2:] = rx(t)
    return m

def compose(gates):
    m = np.eye(4, dtype=np.complex128)
    for g in gates:
        m = g @ m
    return m

def su4_gate(p):
    # U_SU4(params, wires=[w0, w1])
    return compose([
        on0(u3(p[0], p[1], p[2])), on1(u3(p[3], p[4], p[5])), CNOT_01,
        on0(ry(p[6])), on1(rz(p[7])), CNOT_10, on0(ry(p[8])), CNOT_01,
        on0(u3(p[9], p[10], p[11])), on1(u3(p[12], p[13], p[14])),
    ])

def pooling_gate(p):
    # Pooling_ansatz1(params, wires=[c, t])
    return compose([crz_01(p[0]), on0(PAULI_X), crx_01(p[1])])

def apply_gate(M, G, wires):
    """M := G_full @ M  (G is a 4x4 gate on `wires`, wire 0 = MSB)."""
    a, b = wires
    Mt = M.reshape((2,) * N_QUBITS + (DIM,))
    Mt = np.moveaxis(Mt, (a, b), (0, 1))
    rest = Mt.shape[2:]
    Mt = (G @ Mt.reshape(4, -1)).reshape((2, 2) + rest)
    Mt = np.moveaxis(Mt, (0, 1), (a, b))
    return Mt.reshape(DIM, DIM)

def build_circuit_unitary(weights):
    w = np.asarray(weights, dtype=np.float64)
    p1, p2, p3 = w[0:15], w[15:30], w[30:45]
    p4, p5, p6 = w[45:47], w[47:49], w[49:51]

    gate_list = []
    # conv1
    gate_list.append((su4_gate(p1), (0, 7)))
    for i in range(0, N_QUBITS, 2):
        gate_list.append((su4_gate(p1), (i, i + 1)))
    for i in range(1, N_QUBITS - 1, 2):
        gate_list.append((su4_gate(p1), (i, i + 1)))
    # pool1
    for i in range(0, N_QUBITS, 2):
        gate_list.append((pooling_gate(p4), (i, i + 1)))
    # conv2
    for ws in [(0, 6), (0, 2), (4, 6), (2, 4)]:
        gate_list.append((su4_gate(p2), ws))
    # pool2
    for ws in [(2, 0), (6, 4)]:
        gate_list.append((pooling_gate(p5), ws))
    # conv3
    gate_list.append((su4_gate(p3), (0, 4)))
    # pool3
    gate_list.append((pooling_gate(p6), (0, 4)))

    U = np.eye(DIM, dtype=np.complex128)
    for G, ws in gate_list:
        U = apply_gate(U, G, ws)
    return U

def build_wire4_matrix(weights, dtype=jnp.bfloat16):
    """Real symmetric (256,256) M s.t. P(wire4=1 | psi) = psi^T M psi.

    Stored in bf16 by default: the MXU's default precision truncates matmul
    operands to bf16 anyway, so this halves HBM bytes for free. Pass
    dtype=jnp.float32 for a full-precision stream.
    """
    U = build_circuit_unitary(np.asarray(weights, dtype=np.float64))
    idx = np.arange(DIM)
    bit = ((idx >> (N_QUBITS - 1 - 4)) & 1).astype(np.float64)  # wire-4 bit (wire0 = MSB)
    Ur, Ui = U.real, U.imag
    M = Ur.T @ (bit[:, None] * Ur) + Ui.T @ (bit[:, None] * Ui)
    return jnp.asarray(np.ascontiguousarray(M), dtype=dtype)

# ----------------------------------------------------------------------------
# Pallas kernel: quadratic form  p1 = (x @ M) . x / ||x||^2 ,  p0 = 1 - p1.
# ----------------------------------------------------------------------------
def qcnn_kernel(x_ref, m_ref, out_ref):
    xs = x_ref[...]                                        # (TB, 256) bf16 (or f32)
    x = xs.astype(jnp.float32)                             # f32 VPU math (v5e-safe)
    # Single MXU matmul: bf16 operands, f32 accumulation.
    q = jnp.dot(xs, m_ref[...], preferred_element_type=jnp.float32)
    norm2 = jnp.sum(x * x, axis=-1, keepdims=True)         # AmplitudeEmbedding(normalize=True)
    s = jnp.sum(q * x, axis=-1, keepdims=True)             # (TB, 1)
    # Full-precision divide (negligible cost, kernel is memory-bound); zero-row guard.
    p1 = jnp.clip(s / jnp.maximum(norm2, 1e-30), 0.0, 1.0)
    out_ref[:, 0:1] = 1.0 - p1                             # probs(wire 4) = [P(0), P(1)]
    out_ref[:, 1:2] = p1


def _round_up(a, m):
    return ((a + m - 1) // m) * m


def _pick_tiles(B):
    """Return (tile_b, padded_B).

    - B <= 256: latency regime -> a single tile, padded only to a multiple of
      16 rows (bf16 sublane packing), not 128.
    - B > 256: k = max(2, ceil(B / MAX_TILE_B)) tiles so a v7x chip can shard
      the 'parallel' batch axis across both TensorCores, each tile ~512-1024
      rows (amortizes the ~0.35us per-grid-step pipeline overhead) and batch
      padding waste stays < 16 rows per tile.
    """
    if B <= 256:
        tile = _round_up(max(B, 1), 16)
        return tile, tile
    k = max(2, -(-B // MAX_TILE_B))
    tile = _round_up(-(-B // k), 16)
    return tile, k * tile


def qcnn_forward(x, m_wire4, y=None):
    """Matches QCNN_classifier.forward(x, y): returns (B, 2) float32 probs.

    `m_wire4` is the precomputed (256,256) matrix from build_wire4_matrix
    (hoisted out of the per-call path).
    """
    B = x.shape[0]
    xf = jnp.reshape(x, (B, -1)).astype(jnp.float32)       # torch.flatten(start_dim=1)
    F = xf.shape[1]
    assert F <= DIM, "AmplitudeEmbedding on 8 qubits supports at most 256 features"
    if F < DIM:
        xf = jnp.pad(xf, ((0, 0), (0, DIM - F)))           # pad_with=0

    tile_b, Bp = _pick_tiles(B)
    if Bp != B:
        # Padded (zero) rows are guarded in-kernel and sliced off below.
        xf = jnp.pad(xf, ((0, Bp - B), (0, 0)))
    x_in = xf.astype(m_wire4.dtype)                        # bf16 stream: halves HBM bytes

    cost = pl.CostEstimate(
        flops=2 * Bp * DIM * DIM,
        transcendentals=0,
        bytes_accessed=(Bp * DIM * x_in.dtype.itemsize
                        + DIM * DIM * m_wire4.dtype.itemsize
                        + Bp * 2 * 4),
    )

    out = pl.pallas_call(
        qcnn_kernel,
        out_shape=jax.ShapeDtypeStruct((Bp, 2), jnp.float32),
        grid_spec=pl.GridSpec(
            grid=(Bp // tile_b,),
            in_specs=[
                pl.BlockSpec((tile_b, DIM), lambda i: (i, 0)),   # batch tile, pipelined
                pl.BlockSpec((DIM, DIM), lambda i: (0, 0)),      # M: constant block index
                                                                  # -> fetched once, resident
            ],
            out_specs=pl.BlockSpec((tile_b, 2), lambda i: (i, 0)),
        ),
        compiler_params=pltpu.CompilerParams(
            dimension_semantics=("parallel",)),                   # v7x: shard across both TCs
        cost_estimate=cost,
    )(x_in, m_wire4)
    return out[:B]


def make_qcnn_forward(weights, dtype=jnp.bfloat16):
    """Bind the 51 circuit weights once; returns a forward(x, y=None) callable."""
    m = build_wire4_matrix(np.asarray(jax.device_get(weights)), dtype=dtype)

    @jax.jit
    def _fwd(x):
        return qcnn_forward(x, m)

    def fwd(x, y=None):
        return _fwd(x)

    return fwd


if __name__ == "__main__":
    key = jax.random.PRNGKey(0)
    kx, kw, kb = jax.random.split(key, 3)
    # (B=2, C=1, H=16, W=16) -> flatten to 256 features = full 8-qubit amplitude vector.
    x = jax.random.normal(kx, (2, 1, 16, 16), dtype=jnp.float32)
    # Deterministic weights, TorchLayer-style uniform(0, 2*pi) init, 51 params.
    weights = jax.random.uniform(kw, (TOTAL_PARAMS,), minval=0.0,
                                 maxval=2.0 * np.pi, dtype=jnp.float32)
    y = jnp.zeros((2,), jnp.int32)  # unused by forward, kept for signature parity

    forward = make_qcnn_forward(weights)   # unitary built ONCE here, not per call

    # Small-batch (latency) path: single 16-row tile.
    out = jax.block_until_ready(forward(x, y))
    out_np = np.asarray(out)
    assert out_np.shape == (2, 2)
    assert np.all(out_np >= -1e-3) and np.all(out_np <= 1.0 + 1e-3)
    assert np.allclose(out_np.sum(axis=-1), 1.0, atol=1e-3)  # valid probability dist

    # Multi-tile (throughput) path: B=300 -> 2 grid steps, batch padding, bf16 stream.
    # Cross-check against a pure-jnp reference using the same bf16-quantized x / M.
    xb = jax.random.normal(kb, (300, 1, 16, 16), dtype=jnp.float32)
    out_b = np.asarray(jax.block_until_ready(forward(xb)))
    m_q = build_wire4_matrix(np.asarray(jax.device_get(weights))).astype(jnp.float32)
    xq = jnp.reshape(xb, (300, -1)).astype(jnp.bfloat16).astype(jnp.float32)
    num = jnp.sum((xq @ m_q) * xq, axis=-1)
    den = jnp.sum(xq * xq, axis=-1)
    p1_ref = jnp.clip(num / jnp.maximum(den, 1e-30), 0.0, 1.0)
    ref = np.asarray(jnp.stack([1.0 - p1_ref, p1_ref], axis=-1))
    assert out_b.shape == (300, 2)
    assert np.allclose(out_b.sum(axis=-1), 1.0, atol=1e-3)
    assert np.allclose(out_b, ref, atol=1e-2)

    print("KERNEL_OK")
</pallas_src>

<mosaic_0001>
module attributes {stable_mosaic.version = 11 : i64} {
  func.func @qcnn_kernel(%arg0: i32, %arg1: memref<16x256xbf16, #tpu.memory_space<vmem>>, %arg2: memref<256x256xbf16, #tpu.memory_space<vmem>>, %arg3: memref<16x2xf32, #tpu.memory_space<vmem>>) attributes {dimension_semantics = [#tpu.dimension_semantics<parallel>], iteration_bounds = array<i64: 1>, scalar_prefetch = 0 : i64, scratch_operands = 0 : i64, tpu.core_type = #tpu.core_type<tc>, window_params = [{transform_indices = @transform_0, window_bounds = array<i64: 16, 256>}, {pipeline_mode = #tpu.pipeline_mode<synchronous>, transform_indices = @transform_1, window_bounds = array<i64: 256, 256>}, {transform_indices = @transform_2, window_bounds = array<i64: 16, 2>}]} {
    %c0 = arith.constant 0 : index
    %c0_0 = arith.constant 0 : index
    %0 = vector.load %arg1[%c0, %c0_0] : memref<16x256xbf16, #tpu.memory_space<vmem>>, vector<16x256xbf16>
    %1 = arith.extf %0 : vector<16x256xbf16> to vector<16x256xf32>
    %c0_1 = arith.constant 0 : index
    %c0_2 = arith.constant 0 : index
    %2 = vector.load %arg2[%c0_1, %c0_2] : memref<256x256xbf16, #tpu.memory_space<vmem>>, vector<256x256xbf16>
    %cst = arith.constant dense<0.000000e+00> : vector<16x256xf32>
    %3 = tpu.matmul %0, %2, %cst {dimension_numbers = #tpu.dot_dimension_numbers<[1], [0], [0], [1], [0, 0, 1, 1], [], []>} : vector<16x256xbf16>, vector<256x256xbf16>, vector<16x256xf32> -> vector<16x256xf32>
    %4 = arith.mulf %1, %1 : vector<16x256xf32>
    %cst_3 = arith.constant dense<0.000000e+00> : vector<16xf32>
    %5 = vector.multi_reduction <add>, %4, %cst_3 [1] : vector<16x256xf32> to vector<16xf32>
    %6 = vector.shape_cast %5 : vector<16xf32> to vector<16x1xf32>
    %7 = arith.mulf %3, %1 : vector<16x256xf32>
    %cst_4 = arith.constant dense<0.000000e+00> : vector<16xf32>
    %8 = vector.multi_reduction <add>, %7, %cst_4 [1] : vector<16x256xf32> to vector<16xf32>
    %9 = vector.shape_cast %8 : vector<16xf32> to vector<16x1xf32>
    %cst_5 = arith.constant 1.000000e-30 : f32
    %10 = vector.broadcast %cst_5 : f32 to vector<16x1xf32>
    %11 = arith.maximumf %6, %10 : vector<16x1xf32>
    %12 = arith.divf %9, %11 : vector<16x1xf32>
    %cst_6 = arith.constant 0.000000e+00 : f32
    %cst_7 = arith.constant 1.000000e+00 : f32
    %13 = vector.broadcast %cst_6 : f32 to vector<16x1xf32>
    %14 = arith.maximumf %13, %12 : vector<16x1xf32>
    %15 = vector.broadcast %cst_7 : f32 to vector<16x1xf32>
    %16 = arith.minimumf %15, %14 : vector<16x1xf32>
    %cst_8 = arith.constant 1.000000e+00 : f32
    %17 = vector.broadcast %cst_8 : f32 to vector<16x1xf32>
    %18 = arith.subf %17, %16 : vector<16x1xf32>
    %c0_9 = arith.constant 0 : index
    %c0_10 = arith.constant 0 : index
    %19 = vector.load %arg3[%c0_9, %c0_10] : memref<16x2xf32, #tpu.memory_space<vmem>>, vector<16x1xf32>
    tpu.vector_store %arg3[%c0_9, %c0_10], %18 {strides = array<i32>} : memref<16x2xf32, #tpu.memory_space<vmem>>, vector<16x1xf32>,
    %c0_11 = arith.constant 0 : index
    %c1 = arith.constant 1 : index
    %20 = vector.load %arg3[%c0_11, %c1] : memref<16x2xf32, #tpu.memory_space<vmem>>, vector<16x1xf32>
    tpu.vector_store %arg3[%c0_11, %c1], %16 {strides = array<i32>} : memref<16x2xf32, #tpu.memory_space<vmem>>, vector<16x1xf32>,
    return
  }
  func.func @transform_0(%arg0: i32) -> (i32, i32) {
    %c0_i32 = arith.constant 0 : i32
    %c0_i32_0 = arith.constant 0 : i32
    return %arg0, %c0_i32 : i32, i32
  }
  func.func @transform_1(%arg0: i32) -> (i32, i32) {
    %c0_i32 = arith.constant 0 : i32
    %c0_i32_0 = arith.constant 0 : i32
    %c0_i32_1 = arith.constant 0 : i32
    return %c0_i32, %c0_i32_0 : i32, i32
  }
  func.func @transform_2(%arg0: i32) -> (i32, i32) {
    %c0_i32 = arith.constant 0 : i32
    %c0_i32_0 = arith.constant 0 : i32
    return %arg0, %c0_i32 : i32, i32
  }
}

</mosaic_0001>

<bundles_post_ra>
// kernel: _fwd.1
= control target key start
LH: loop header
LB: loop body
LE: loop exit
PB: predicated region body
PF: predicated region fallthrough
CT: control target
= control target key end

     0   :  { %7 = vsyncpa [#allocation3], 0  ;;  %s563_s12 = smov [#allocation2]   ;;  %s564_s14 = smov 128   ;;  %s614_s0 = inlined_call_operand.vmem [shape: bf16[16,256], index: 0, kind: input, shape index: {}]   ;;  %s615_s1 = inlined_call_operand.hbm [shape: bf16[256,256], index: 1, kind: input, shape index: {}]   ;;  %s616_s2 = inlined_call_operand.vmem [shape: f32[16,2], index: 2, kind: output, shape index: {}]  }
   0x1   :  { %s14_s11 = sshll.u32 %s615_s1, 4  ;;  %s16_s13 = sshll.u32 %s563_s12, 4  ;;  %s15_s11 = int_to_ptr.hbm [resolvable:$true] %s14_s11  ;;  %s17_s13 = int_to_ptr.vmem [resolvable:$true] %s16_s13 }
   0x2   :  { %s565_s15 = smov 8  }
   0x3   :  { %22 = dma.hbm_to_vmem [thread:$0]  %s15_s11, 4096, %s17_s13, [#allocation3], %s564_s14, %s564_s14, %s565_s15  }
   0x4   :  { %561 = dma.done.wait [#allocation3], 4096  }
   0x5   :  { %562 = vsyncadd [#allocation3], 4294963200  ;;  %v426_v0 = vld [vmem:[#allocation2 + $0x70] sm:$0xf]  ;;  %v513_v1 = vld [vmem:[#allocation2 + $0x74] sm:$0xf0] }
   0x6   :  { %v490_v2 = vld [vmem:[#allocation2 + $0xf0] sm:$0xf]  ;;  %v427_v3 = vor.u32 %v513_v1, %v426_v0  ;;  %v529_v4 = vld [vmem:[#allocation2 + $0xf4] sm:$0xf0]  ;;  %v512_v5 = vld [vmem:[#allocation2 + $0x74] sm:$0xf] }
   0x7   :  { %v428_v6 = vld [vmem:[#allocation2 + $0x78] sm:$0xf0]  ;;  %v491_v7 = vor.u32 %v529_v4, %v490_v2  ;;  %v528_v9 = vld [vmem:[#allocation2 + $0xf4] sm:$0xf]  ;;  %v418_v11 = vld [vmem:[#allocation2 + $0x60] sm:$0xf] }
   0x8   :  { %v431_v8 = vor.u32 %v512_v5, %v428_v6  ;;  %v492_v10 = vld [vmem:[#allocation2 + $0xf8] sm:$0xf0]  ;;  %235 = vmatpush.bf16.msra.mxu0 %v427_v3  ;;  %v511_v13 = vld [vmem:[#allocation2 + $0x64] sm:$0xf0]  ;;  %v482_v14 = vld [vmem:[#allocation2 + $0xe0] sm:$0xf] }
   0x9   :  { %v495_v12 = vor.u32 %v528_v9, %v492_v10  ;;  %v527_v15 = vld [vmem:[#allocation2 + $0xe4] sm:$0xf0]  ;;  %249 = vmatpush.bf16.msra.mxu1 %v491_v7  ;;  %v419_v16 = vor.u32 %v511_v13, %v418_v11  ;;  %v510_v18 = vld [vmem:[#allocation2 + $0x64] sm:$0xf]  ;;  %v420_v19 = vld [vmem:[#allocation2 + $0x68] sm:$0xf0] }
   0xa   :  { %263 = vmatpush.bf16.msra.mxu2 %v431_v8  ;;  %v483_v17 = vor.u32 %v527_v15, %v482_v14  ;;  %v526_v20 = vld [vmem:[#allocation2 + $0xe4] sm:$0xf]  ;;  %v423_v21 = vor.u32 %v510_v18, %v420_v19  ;;  %v484_v22 = vld [vmem:[#allocation2 + $0xe8] sm:$0xf0]  ;;  %v410_v23 = vld [vmem:[#allocation2 + $0x50] sm:$0xf] }
   0xb   :  { %277 = vmatpush.bf16.msra.mxu3 %v495_v12  ;;  %v509_v24 = vld [vmem:[#allocation2 + $0x54] sm:$0xf0]  ;;  %v487_v25 = vor.u32 %v526_v20, %v484_v22  ;;  %v474_v26 = vld [vmem:[#allocation2 + $0xd0] sm:$0xf]  ;;  %v508_v28 = vld [vmem:[#allocation2 + $0x54] sm:$0xf] }
   0xc   :  { %v525_v27 = vld [vmem:[#allocation2 + $0xd4] sm:$0xf0]  ;;  %236 = vmatpush.bf16.msra.mxu0 %v419_v16  ;;  %v411_v29 = vor.u32 %v509_v24, %v410_v23  ;;  %v412_v30 = vld [vmem:[#allocation2 + $0x58] sm:$0xf0]  ;;  %v524_v31 = vld [vmem:[#allocation2 + $0xd4] sm:$0xf] }
   0xd   :  { %v476_v32 = vld [vmem:[#allocation2 + $0xd8] sm:$0xf0]  ;;  %250 = vmatpush.bf16.msra.mxu1 %v483_v17  ;;  %v475_v33 = vor.u32 %v525_v27, %v474_v26  ;;  %v415_v34 = vor.u32 %v508_v28, %v412_v30  ;;  %v402_v35 = vld [vmem:[#allocation2 + $0x40] sm:$0xf]  ;;  %v507_v36 = vld [vmem:[#allocation2 + $0x44] sm:$0xf0] }
   0xe   :  { %264 = vmatpush.bf16.msra.mxu2 %v423_v21  ;;  %v466_v37 = vld [vmem:[#allocation2 + $0xc0] sm:$0xf]  ;;  %v479_v38 = vor.u32 %v524_v31, %v476_v32  ;;  %v523_v39 = vld [vmem:[#allocation2 + $0xc4] sm:$0xf0]  ;;  %v506_v40 = vld [vmem:[#allocation2 + $0x44] sm:$0xf]  ;;  %v403_v44 = vor.u32 %v507_v36, %v402_v35 }
   0xf   :  { %278 = vmatpush.bf16.msra.mxu3 %v487_v25  ;;  %v404_v41 = vld [vmem:[#allocation2 + $0x48] sm:$0xf0]  ;;  %v522_v42 = vld [vmem:[#allocation2 + $0xc4] sm:$0xf]  ;;  %v467_v45 = vor.u32 %v523_v39, %v466_v37  ;;  %v394_v47 = vld [vmem:[#allocation2 + $0x30] sm:$0xf] }
  0x10   :  { %v468_v43 = vld [vmem:[#allocation2 + $0xc8] sm:$0xf0]  ;;  %237 = vmatpush.bf16.msra.mxu0 %v411_v29  ;;  %v407_v46 = vor.u32 %v506_v40, %v404_v41  ;;  %v505_v48 = vld [vmem:[#allocation2 + $0x34] sm:$0xf0]  ;;  %v458_v49 = vld [vmem:[#allocation2 + $0xb0] sm:$0xf] }
  0x11   :  { %251 = vmatpush.bf16.msra.mxu1 %v475_v33  ;;  %v471_v50 = vor.u32 %v522_v42, %v468_v43  ;;  %v521_v51 = vld [vmem:[#allocation2 + $0xb4] sm:$0xf0]  ;;  %v504_v52 = vld [vmem:[#allocation2 + $0x34] sm:$0xf]  ;;  %v396_v53 = vld [vmem:[#allocation2 + $0x38] sm:$0xf0]  ;;  %v395_v56 = vor.u32 %v505_v48, %v394_v47 }
  0x12   :  { %265 = vmatpush.bf16.msra.mxu2 %v415_v34  ;;  %v520_v54 = vld [vmem:[#allocation2 + $0xb4] sm:$0xf]  ;;  %v460_v55 = vld [vmem:[#allocation2 + $0xb8] sm:$0xf0]  ;;  %v459_v57 = vor.u32 %v521_v51, %v458_v49  ;;  %v399_v58 = vor.u32 %v504_v52, %v396_v53  ;;  %v386_v59 = vld [vmem:[#allocation2 + $0x20] sm:$0xf] }
  0x13   :  { %279 = vmatpush.bf16.msra.mxu3 %v479_v38  ;;  %v503_v60 = vld [vmem:[#allocation2 + $0x24] sm:$0xf0]  ;;  %v450_v61 = vld [vmem:[#allocation2 + $0xa0] sm:$0xf]  ;;  %v463_v62 = vor.u32 %v520_v54, %v460_v55  ;;  %v502_v0 = vld [vmem:[#allocation2 + $0x24] sm:$0xf] }
  0x14   :  { %238 = vmatpush.bf16.msra.mxu0 %v403_v44  ;;  %v519_v63 = vld [vmem:[#allocation2 + $0xa4] sm:$0xf0]  ;;  %v388_v1 = vld [vmem:[#allocation2 + $0x28] sm:$0xf0]  ;;  %v518_v2 = vld [vmem:[#allocation2 + $0xa4] sm:$0xf]  ;;  %v387_v4 = vor.u32 %v503_v60, %v386_v59 }
  0x15   :  { %252 = vmatpush.bf16.msra.mxu1 %v467_v45  ;;  %v452_v3 = vld [vmem:[#allocation2 + $0xa8] sm:$0xf0]  ;;  %v378_v5 = vld [vmem:[#allocation2 + $0x10] sm:$0xf]  ;;  %v501_v6 = vld [vmem:[#allocation2 + $0x14] sm:$0xf0]  ;;  %v451_v7 = vor.u32 %v519_v63, %v450_v61  ;;  %v391_v8 = vor.u32 %v502_v0, %v388_v1 }
  0x16   :  { %266 = vmatpush.bf16.msra.mxu2 %v407_v46  ;;  %v442_v9 = vld [vmem:[#allocation2 + $0x90] sm:$0xf]  ;;  %v517_v10 = vld [vmem:[#allocation2 + $0x94] sm:$0xf0]  ;;  %v500_v11 = vld [vmem:[#allocation2 + $0x14] sm:$0xf]  ;;  %v455_v12 = vor.u32 %v518_v2, %v452_v3  ;;  %v379_v17 = vor.u32 %v501_v6, %v378_v5 }
  0x17   :  { %280 = vmatpush.bf16.msra.mxu3 %v471_v50  ;;  %v380_v13 = vld [vmem:[#allocation2 + $0x18] sm:$0xf0]  ;;  %v516_v14 = vld [vmem:[#allocation2 + $0x94] sm:$0xf]  ;;  %v27_v16 = vld [vmem:[%s614_s0] sm:$0xff]  ;;  %v443_v21 = vor.u32 %v517_v10, %v442_v9  ;;  %vm349_vm8 = vcmask 7168  }
  0x18   :  { %239 = vmatpush.bf16.msra.mxu0 %v395_v56  ;;  %v444_v15 = vld [vmem:[#allocation2 + $0x98] sm:$0xf0]  ;;  %v29_v18 = vunpack.c.l.bf16 %v27_v16  ;;  %v30_v19 = vunpack.c.h.bf16 %v27_v16  ;;  %v28_v20 = vld [vmem:[%s614_s0 + $0x8] sm:$0xff]  ;;  %v383_v22 = vor.u32 %v500_v11, %v380_v13  ;;  %v370_v24 = vld [vmem:[#allocation2] sm:$0xf]  ;;  %vm352_vm9 = vcmask 15368  }
  0x19   :  { %253 = vmatpush.bf16.msra.mxu1 %v459_v57  ;;  %v447_v23 = vor.u32 %v516_v14, %v444_v15  ;;  %v499_v25 = vld [vmem:[#allocation2 + $0x4] sm:$0xf0]  ;;  %v434_v26 = vld [vmem:[#allocation2 + $0x80] sm:$0xf]  ;;  %v498_v28 = vld [vmem:[#allocation2 + $0x4] sm:$0xf]  ;;  %v31_v32 = vunpack.c.l.bf16 %v28_v20  ;;  %v32_v33 = vunpack.c.h.bf16 %v28_v20 }
  0x1a   :  { %267 = vmatpush.bf16.msra.mxu2 %v399_v58  ;;  %v515_v27 = vld [vmem:[#allocation2 + $0x84] sm:$0xf0]  ;;  %v372_v29 = vld [vmem:[#allocation2 + $0x8] sm:$0xf0]  ;;  %v291_v30 = vmul.f32 %v29_v18, %v29_v18  ;;  %v292_v31 = vmul.f32 %v30_v19, %v30_v19  ;;  %v514_v34 = vld [vmem:[#allocation2 + $0x84] sm:$0xf]  ;;  %v371_v36 = vor.u32 %v499_v25, %v370_v24 }
  0x1b   :  { %281 = vmatpush.bf16.msra.mxu3 %v463_v62  ;;  %v436_v35 = vld [vmem:[#allocation2 + $0x88] sm:$0xf0]  ;;  %v362_v37 = vld [vmem:[%s614_s0] sm:$0xf]  ;;  %v497_v38 = vld [vmem:[%s614_s0 + $0x4] sm:$0xf0]  ;;  %v435_v40 = vor.u32 %v515_v27, %v434_v26  ;;  %v375_v41 = vor.u32 %v498_v28, %v372_v29  ;;  %v293_v45 = vmul.f32 %v31_v32, %v31_v32  ;;  %v294_v46 = vmul.f32 %v32_v33, %v32_v33 }
  0x1c   :  { %240 = vmatpush.bf16.msra.mxu0 %v387_v4  ;;  %v295_v39 = vadd.f32 %v292_v31, %v291_v30  ;;  %v496_v42 = vld [vmem:[%s614_s0 + $0x4] sm:$0xf]  ;;  %v364_v43 = vld [vmem:[%s614_s0 + $0x8] sm:$0xf0]  ;;  %v439_v44 = vor.u32 %v514_v34, %v436_v35  ;;  %v363_v47 = vor.u32 %v497_v38, %v362_v37 }
  0x1d   :  { %254 = vmatpush.bf16.msra.mxu1 %v451_v7  ;;  %v367_v48 = vor.u32 %v496_v42, %v364_v43  ;;  %v298_v49 = vadd.f32 %v294_v46, %v293_v45 }
  0x1e   :  { %268 = vmatpush.bf16.msra.mxu2 %v391_v8  ;;  %296 = vadd.xlane.f32.xlu0 %v295_v39 }
  0x1f   :  { %282 = vmatpush.bf16.msra.mxu3 %v455_v12 }
  0x20   :  { %241 = vmatpush.bf16.msra.mxu0 %v379_v17 }
  0x21   :  { %255 = vmatpush.bf16.msra.mxu1 %v443_v21 }
  0x22   :  { %269 = vmatpush.bf16.msra.mxu2 %v383_v22 }
  0x23   :  { %283 = vmatpush.bf16.msra.mxu3 %v447_v23 }
  0x24   :  { %242 = vmatpush.bf16.msra.mxu0 %v371_v36 }
  0x25   :  { %256 = vmatpush.bf16.msra.mxu1 %v435_v40 }
  0x26   :  { %270 = vmatpush.bf16.msra.mxu2 %v375_v41  ;;  %299 = vadd.xlane.f32.xlu0 %v298_v49 }
  0x27   :  { %284 = vmatpush.bf16.msra.mxu3 %v439_v44  ;;  %243 = vmatmul.bf16.vlgmr.msra.gmra.mxu0 %v363_v47 }
  0x28   :  { %257 = vmatmul.bf16.vlgmr.msra.gmra.mxu1 %v367_v48 }
  0x29   :  { %271 = vmatmul.bf16.vlgmr.msra.gmra.mxu2 %v363_v47 }
  0x2a   :  { %285 = vmatmul.bf16.vlgmr.msra.gmra.mxu3 %v367_v48 }
  0x91   :  { %v297_v4 = vpop.xlane.xlu0 %296 }
  0x92   :  { %v311_v5 = vmax.f32 %v297_v4, 1e-30 }
  0x94   :  { %533 = vrcp.f32 %v311_v5  ;;  %vm318_vm0 = vweird.f32 %v311_v5  ;;  %v324_v14 = vand.u32 2147483648, %v311_v5  ;;  %v322_v16 = vand.u32 2147483647, %v311_v5 }
  0x96   :  { %vm323_vm3 = vcmp.eq.f32.partialorder %v322_v16, 8.507059e+37 }
  0x99   :  { %v300_v6 = vpop.xlane.xlu0 %299 }
  0x9a   :  { %v312_v7 = vmax.f32 %v300_v6, 1e-30  ;;  %v534_v8 = vpop.eup %533 }
  0x9b   :  { %v314_v9 = vmul.f32 %v534_v8, %v311_v5  ;;  %vm319_vm1 = vweird.f32 %v534_v8 }
  0x9c   :  { %535 = vrcp.f32 %v312_v7  ;;  %vm320_vm2 = vmor %vm318_vm0, %vm319_vm1  ;;  %vm333_vm4 = vweird.f32 %v312_v7  ;;  %v339_v23 = vand.u32 2147483648, %v312_v7  ;;  %v337_v26 = vand.u32 2147483647, %v312_v7 }
  0x9d   :  { %v315_v10 = vsub.f32 1.0, %v314_v9 }
  0x9e   :  { %v340_v28 = vor.u32 1.1754944e-38, %v339_v23  ;;  %vm338_vm7 = vcmp.eq.f32.partialorder %v337_v26, 8.507059e+37 }
  0x9f   :  { %v316_v13 = vmul.f32 %v534_v8, %v315_v10 }
  0xa1   :  { %v317_v15 = vadd.f32 %v534_v8, %v316_v13 }
  0xa2   :  { %v536_v11 = vpop.eup %535 }
  0xa3   :  { %v329_v12 = vmul.f32 %v536_v11, %v312_v7  ;;  %vm334_vm5 = vweird.f32 %v536_v11 }
  0xa4   :  { %v244_v50 = vpop.f32.mrf.mxu0  ;;  %vm335_vm6 = vmor %vm333_vm4, %vm334_vm5 }
  0xa5   :  { %v258_v51 = vpop.f32.mrf.mxu1  ;;  %v330_v17 = vsub.f32 1.0, %v329_v12 }
  0xa6   :  { %v259_v52 = vadd.f32 %v258_v51, %v244_v50 }
  0xa7   :  { %v331_v20 = vmul.f32 %v536_v11, %v330_v17 }
  0xa8   :  { %v301_v56 = vmul.f32 %v259_v52, %v29_v18  ;;  %v325_v18 = vor.u32 1.1754944e-38, %v324_v14 }
  0xa9   :  { %v332_v25 = vadd.f32 %v536_v11, %v331_v20 }
  0xab   :  { %v336_v30 = vsel %vm335_vm6, %v536_v11, %v332_v25 }
  0xac   :  { %v272_v53 = vpop.f32.mrf.mxu2  ;;  %v246_v58 = vpop.f32.mrf.mxu0 }
  0xad   :  { %v286_v54 = vpop.f32.mrf.mxu3  ;;  %v260_v59 = vpop.f32.mrf.mxu1 }
  0xae   :  { %v287_v55 = vadd.f32 %v286_v54, %v272_v53  ;;  %v261_v61 = vadd.f32 %v260_v59, %v246_v58 }
  0xb0   :  { %v302_v57 = vmul.f32 %v287_v55, %v30_v19  ;;  %v303_v1 = vmul.f32 %v261_v61, %v31_v32  ;;  %v321_v19 = vsel %vm320_vm2, %v534_v8, %v317_v15 }
  0xb1   :  { %v326_v22 = vsel %vm323_vm3, %v325_v18, %v321_v19 }
  0xb2   :  { %v305_v60 = vadd.f32 %v302_v57, %v301_v56 }
  0xb4   :  { %306 = vadd.xlane.f32.xlu1 %v305_v60  ;;  %v274_v62 = vpop.f32.mrf.mxu2 }
  0xb5   :  { %v288_v63 = vpop.f32.mrf.mxu3 }
  0xb6   :  { %v289_v0 = vadd.f32 %v288_v63, %v274_v62 }
  0xb8   :  { %v304_v2 = vmul.f32 %v289_v0, %v32_v33  ;;  %v341_v33 = vsel %vm338_vm7, %v340_v28, %v336_v30 }
  0xba   :  { %v308_v3 = vadd.f32 %v304_v2, %v303_v1 }
  0xbc   :  { %309 = vadd.xlane.f32.xlu1 %v308_v3 }
 0x127   :  { %v307_v21 = vpop.xlane.xlu1 %306 }
 0x128   :  { %v327_v24 = vmul.f32 %v326_v22, %v307_v21 }
 0x12a   :  { %v343_v27 = vmax.f32 %v327_v24, 0.0 }
 0x12c   :  { %v345_v29 = vmin.f32 %v343_v27, 1.0 }
 0x12e   :  { %v347_v31 = vsub.f32 1.0, %v345_v29 }
 0x12f   :  { %v310_v32 = vpop.xlane.xlu1 %309 }
 0x130   :  { %350 = vst.msk [vmem:[%s616_s2] sm:$0xff] %vm349_vm8, %v347_v31  ;;  %v342_v34 = vmul.f32 %v341_v33, %v310_v32 }
 0x131   :  { %353 = vst.msk [vmem:[%s616_s2] sm:$0xff] %vm352_vm9, %v345_v29 }
 0x132   :  { %v344_v35 = vmax.f32 %v342_v34, 0.0 }
 0x134   :  { %v346_v36 = vmin.f32 %v344_v35, 1.0 }
 0x136   :  { %v348_v37 = vsub.f32 1.0, %v346_v36 }
 0x138   :  { %351 = vst.msk [vmem:[%s616_s2 + $0x8] sm:$0xff] %vm349_vm8, %v348_v37 }
 0x139   :  { %354 = vst.msk [vmem:[%s616_s2 + $0x8] sm:$0xff] %vm352_vm9, %v346_v36 }
 0x13a   :  { %359 = vsyncpa [#allocation3], 1 }

</bundles_post_ra>
